<compile_context>
chip_gen: v6e
topology: v6e:2x2x1
jax: 0.10.0
libtpu: 0.0.40
codegen_flags: <defaults>
</compile_context>

<pallas_src>
import jax
import jax.numpy as jnp
from jax import lax
from jax.experimental import pallas as pl
from jax.experimental.pallas import tpu as pltpu


_VMEM_LIMIT = 32 * 1024 * 1024     # explicit scoped-VMEM limit (v5e default is only 16 MiB)


def _pick_tile(l_out):
    """Output-length tile: a multiple of 128 that divides l_out, else the full length."""
    for cand in (256, 128):
        if l_out % cand == 0:
            return cand
    # TODO(synk): awkward L_out falls back to a single full-length tile per batch row.
    return l_out


# ----------------------------------------------------------------------------
# Kernels (NCL layout in-kernel: sublanes = channels, lanes = length)
# ----------------------------------------------------------------------------
def _downsample_conv1d_kernel(x_ref, w_ref, b_ref, o_ref, carry_ref):
    """Conv1d(k=3, stride=2, pad=1) for one (batch, length-tile) grid cell.

    x_ref    : (1, Cin, 2*TL)   input slab, columns [2*TL*j, 2*TL*(j+1))
    w_ref    : (3, Cout, Cin)   weights, tap-major
    b_ref    : (Cout, 1)
    o_ref    : (1, Cout, TL)
    carry_ref: (Cin, 1) VMEM    last input column of the previous tile (left halo)
    """
    j = pl.program_id(1)
    x = x_ref[0].astype(jnp.float32)                 # (Cin, 2*TL), lanes = length
    cin, two_tl = x.shape
    tl = o_ref.shape[-1]

    # out[:, o'] = W0 @ x[2o'-1] + W1 @ x[2o'] + W2 @ x[2o'+1] + b  (local indices)
    # Left halo x[:, -1] = previous tile's last column, or the conv's zero padding
    # at the very start of the sequence.  Read the carry before overwriting it.
    halo = jnp.where(j == 0, 0.0, carry_ref[...])    # (Cin, 1)
    carry_ref[...] = x[:, two_tl - 1:two_tl]         # saved for grid step (n, j+1)

    # De-interleave the three stride-2 taps with 0/1 selection matmuls on the MXU
    # (keeps the de-interleave in-kernel, avoids lane-strided slicing / relayouts).
    rows = lax.broadcasted_iota(jnp.int32, (two_tl, tl), 0)   # input column m
    cols = lax.broadcasted_iota(jnp.int32, (two_tl, tl), 1)   # output column o'
    s_m1 = (rows == 2 * cols - 1).astype(jnp.float32)         # tap 0 (o'=0 column is 0)
    s_ev = (rows == 2 * cols).astype(jnp.float32)             # tap 1
    s_od = (rows == 2 * cols + 1).astype(jnp.float32)         # tap 2

    x0 = jnp.dot(x, s_m1, preferred_element_type=jnp.float32)  # (Cin, TL): x[2o'-1]
    x1 = jnp.dot(x, s_ev, preferred_element_type=jnp.float32)  # (Cin, TL): x[2o']
    x2 = jnp.dot(x, s_od, preferred_element_type=jnp.float32)  # (Cin, TL): x[2o'+1]

    # Patch the first output column of tap 0 with the halo column.
    lane0 = lax.broadcasted_iota(jnp.int32, (cin, tl), 1) == 0
    x0 = x0 + jnp.where(lane0, halo, 0.0)

    # Channel contraction (K = Cin); output stays (Cout, TL) -> lane-dense store.
    acc = jnp.dot(w_ref[0], x0, preferred_element_type=jnp.float32)
    acc = acc + jnp.dot(w_ref[1], x1, preferred_element_type=jnp.float32)
    acc = acc + jnp.dot(w_ref[2], x2, preferred_element_type=jnp.float32)
    acc = acc + b_ref[...]                                     # (Cout, 1) broadcast
    o_ref[0] = acc.astype(o_ref.dtype)


def _downsample_avgpool1d_kernel(x_ref, o_ref):
    """AvgPool1d(kernel=2, stride=2) for one (batch, length-tile) grid cell.

    x_ref: (1, C, 2*TL)   single contiguous input block (pair-sum done in-kernel)
    o_ref: (1, C, TL)
    """
    x = x_ref[0].astype(jnp.float32)                 # (C, 2*TL)
    two_tl = x.shape[-1]
    tl = o_ref.shape[-1]
    rows = lax.broadcasted_iota(jnp.int32, (two_tl, tl), 0)
    cols = lax.broadcasted_iota(jnp.int32, (two_tl, tl), 1)
    # pairs (2o', 2o'+1) -> o', weight 0.5 each
    s_pool = jnp.where((rows // 2) == cols, 0.5, 0.0).astype(jnp.float32)
    o_ref[0] = jnp.dot(x, s_pool, preferred_element_type=jnp.float32).astype(o_ref.dtype)


# ----------------------------------------------------------------------------
# Wrapper (no transposes, no padding, no de-interleave in HBM)
# ----------------------------------------------------------------------------
def downsample_1d(x_ncl, *, use_conv, weight=None, bias=None):
    """Forward pass of Downsample (dims=1).  x_ncl: (N, C, L), L even."""
    n, c_in, length = x_ncl.shape
    # TODO(synk): odd L (allowed by PyTorch's conv path) not handled; L assumed even.
    assert length % 2 == 0, "even length assumed"
    l_out = length // 2
    tl = _pick_tile(l_out)
    nb = l_out // tl

    if use_conv:
        c_out, _, k = weight.shape                   # PyTorch layout (Cout, Cin, 3)
        assert k == 3
        w_r = jnp.transpose(weight, (2, 0, 1))       # (3, Cout, Cin), tap-major
        b_r = bias.reshape(c_out, 1)

        return pl.pallas_call(
            _downsample_conv1d_kernel,
            out_shape=jax.ShapeDtypeStruct((n, c_out, l_out), x_ncl.dtype),
            grid=(n, nb),
            in_specs=[
                pl.BlockSpec((1, c_in, 2 * tl), lambda i, j: (i, 0, j)),
                pl.BlockSpec((3, c_out, c_in), lambda i, j: (0, 0, 0)),
                pl.BlockSpec((c_out, 1), lambda i, j: (0, 0)),
            ],
            out_specs=pl.BlockSpec((1, c_out, tl), lambda i, j: (i, 0, j)),
            scratch_shapes=[pltpu.VMEM((c_in, 1), jnp.float32)],   # left-halo carry
            compiler_params=pltpu.CompilerParams(
                # j must run sequentially (carry flows j -> j+1); n is megacore-parallel.
                dimension_semantics=("parallel", "arbitrary"),
                vmem_limit_bytes=_VMEM_LIMIT),
        )(x_ncl, w_r, b_r)

    # AvgPool path: single contiguous input block per tile, pair-sum in-kernel.
    return pl.pallas_call(
        _downsample_avgpool1d_kernel,
        out_shape=jax.ShapeDtypeStruct((n, c_in, l_out), x_ncl.dtype),
        grid=(n, nb),
        in_specs=[pl.BlockSpec((1, c_in, 2 * tl), lambda i, j: (i, 0, j))],
        out_specs=pl.BlockSpec((1, c_in, tl), lambda i, j: (i, 0, j)),
        compiler_params=pltpu.CompilerParams(
            dimension_semantics=("parallel", "parallel"),
            vmem_limit_bytes=_VMEM_LIMIT),
    )(x_ncl)


# ----------------------------------------------------------------------------
# Reference (plain JAX) for verification
# ----------------------------------------------------------------------------
def _ref_conv(x_ncl, weight, bias):
    y = lax.conv_general_dilated(
        x_ncl, weight, window_strides=(2,), padding=((1, 1),),
        dimension_numbers=("NCH", "OIH", "NCH"))
    return y + bias[None, :, None]


def _ref_avgpool(x_ncl):
    n, c, length = x_ncl.shape
    return x_ncl.reshape(n, c, length // 2, 2).mean(axis=-1)


if __name__ == "__main__":
    key = jax.random.PRNGKey(0)
    k_x, k_w, k_b, k_x2 = jax.random.split(key, 4)

    N, C, L = 2, 4, 16
    C_OUT = 4

    x = jax.random.normal(k_x, (N, C, L), dtype=jnp.float32)
    weight = jax.random.normal(k_w, (C_OUT, C, 3), dtype=jnp.float32) * 0.1
    bias = jax.random.normal(k_b, (C_OUT,), dtype=jnp.float32) * 0.1

    # use_conv=True path (single length tile)
    y_conv = jax.block_until_ready(downsample_1d(x, use_conv=True, weight=weight, bias=bias))
    assert y_conv.shape == (N, C_OUT, L // 2)
    assert jnp.allclose(y_conv, _ref_conv(x, weight, bias), atol=1e-4, rtol=1e-4)

    # use_conv=False path (avg pool)
    y_pool = jax.block_until_ready(downsample_1d(x, use_conv=False))
    assert y_pool.shape == (N, C, L // 2)
    assert jnp.allclose(y_pool, _ref_avgpool(x), atol=1e-5, rtol=1e-5)

    # Longer sequence: exercises the L-tiling grid and the cross-tile halo carry.
    L2 = 1024
    x2 = jax.random.normal(k_x2, (N, C, L2), dtype=jnp.float32)
    y2 = jax.block_until_ready(downsample_1d(x2, use_conv=True, weight=weight, bias=bias))
    assert jnp.allclose(y2, _ref_conv(x2, weight, bias), atol=1e-4, rtol=1e-4)
    y2p = jax.block_until_ready(downsample_1d(x2, use_conv=False))
    assert jnp.allclose(y2p, _ref_avgpool(x2), atol=1e-5, rtol=1e-5)

    print("KERNEL_OK")
</pallas_src>

<mosaic_0001>
module attributes {stable_mosaic.version = 11 : i64} {
  func.func @_downsample_conv1d_kernel(%arg0: i32, %arg1: i32, %arg2: memref<1x4x16xf32, #tpu.memory_space<vmem>>, %arg3: memref<3x4x4xf32, #tpu.memory_space<vmem>>, %arg4: memref<4x1xf32, #tpu.memory_space<vmem>>, %arg5: memref<1x4x8xf32, #tpu.memory_space<vmem>>, %arg6: memref<4x1xf32, #tpu.memory_space<vmem>>) attributes {dimension_semantics = [#tpu.dimension_semantics<parallel>, #tpu.dimension_semantics<arbitrary>], iteration_bounds = array<i64: 2, 1>, scalar_prefetch = 0 : i64, scratch_operands = 1 : i64, tpu.core_type = #tpu.core_type<tc>, window_params = [{transform_indices = @transform_0, window_bounds = array<i64: 1, 4, 16>}, {pipeline_mode = #tpu.pipeline_mode<synchronous>, transform_indices = @transform_1, window_bounds = array<i64: 3, 4, 4>}, {pipeline_mode = #tpu.pipeline_mode<synchronous>, transform_indices = @transform_2, window_bounds = array<i64: 4, 1>}, {transform_indices = @transform_3, window_bounds = array<i64: 1, 4, 8>}]} {
    %c0 = arith.constant 0 : index
    %c0_0 = arith.constant 0 : index
    %c0_1 = arith.constant 0 : index
    %0 = vector.load %arg2[%c0, %c0_0, %c0_1] : memref<1x4x16xf32, #tpu.memory_space<vmem>>, vector<1x4x16xf32>
    %1 = vector.shape_cast %0 : vector<1x4x16xf32> to vector<4x16xf32>
    %c0_i32 = arith.constant 0 : i32
    %2 = arith.cmpi eq, %arg1, %c0_i32 : i32
    %c0_2 = arith.constant 0 : index
    %c0_3 = arith.constant 0 : index
    %3 = vector.load %arg6[%c0_2, %c0_3] : memref<4x1xf32, #tpu.memory_space<vmem>>, vector<4x1xf32>
    %cst = arith.constant 0.000000e+00 : f32
    %4 = vector.broadcast %cst : f32 to vector<4x1xf32>
    %5 = arith.select %2, %4, %3 : vector<4x1xf32>
    %6 = vector.extract_strided_slice %1 {offsets = [0, 15], sizes = [4, 1], strides = [1, 1]} : vector<4x16xf32> to vector<4x1xf32>
    %c0_4 = arith.constant 0 : index
    %c0_5 = arith.constant 0 : index
    %7 = vector.load %arg6[%c0_4, %c0_5] : memref<4x1xf32, #tpu.memory_space<vmem>>, vector<4x1xf32>
    tpu.vector_store %arg6[%c0_4, %c0_5], %6 {strides = array<i32>} : memref<4x1xf32, #tpu.memory_space<vmem>>, vector<4x1xf32>,
    %8 = tpu.iota {dimensions = array<i32: 0>} : vector<16x8xi32>
    %9 = tpu.iota {dimensions = array<i32: 1>} : vector<16x8xi32>
    %c2_i32 = arith.constant 2 : i32
    %10 = vector.broadcast %c2_i32 : i32 to vector<16x8xi32>
    %11 = arith.muli %10, %9 : vector<16x8xi32>
    %c1_i32 = arith.constant 1 : i32
    %12 = vector.broadcast %c1_i32 : i32 to vector<16x8xi32>
    %13 = arith.subi %11, %12 : vector<16x8xi32>
    %14 = arith.cmpi eq, %8, %13 : vector<16x8xi32>
    %15 = arith.extui %14 : vector<16x8xi1> to vector<16x8xi32>
    %16 = arith.sitofp %15 : vector<16x8xi32> to vector<16x8xf32>
    %c2_i32_6 = arith.constant 2 : i32
    %17 = vector.broadcast %c2_i32_6 : i32 to vector<16x8xi32>
    %18 = arith.muli %17, %9 : vector<16x8xi32>
    %19 = arith.cmpi eq, %8, %18 : vector<16x8xi32>
    %20 = arith.extui %19 : vector<16x8xi1> to vector<16x8xi32>
    %21 = arith.sitofp %20 : vector<16x8xi32> to vector<16x8xf32>
    %c2_i32_7 = arith.constant 2 : i32
    %22 = vector.broadcast %c2_i32_7 : i32 to vector<16x8xi32>
    %23 = arith.muli %22, %9 : vector<16x8xi32>
    %c1_i32_8 = arith.constant 1 : i32
    %24 = vector.broadcast %c1_i32_8 : i32 to vector<16x8xi32>
    %25 = arith.addi %23, %24 : vector<16x8xi32>
    %26 = arith.cmpi eq, %8, %25 : vector<16x8xi32>
    %27 = arith.extui %26 : vector<16x8xi1> to vector<16x8xi32>
    %28 = arith.sitofp %27 : vector<16x8xi32> to vector<16x8xf32>
    %cst_9 = arith.constant dense<0.000000e+00> : vector<4x8xf32>
    %29 = tpu.matmul %1, %16, %cst_9 {dimension_numbers = #tpu.dot_dimension_numbers<[1], [0], [0], [1], [0, 0, 1, 1], [], []>} : vector<4x16xf32>, vector<16x8xf32>, vector<4x8xf32> -> vector<4x8xf32>
    %cst_10 = arith.constant dense<0.000000e+00> : vector<4x8xf32>
    %30 = tpu.matmul %1, %21, %cst_10 {dimension_numbers = #tpu.dot_dimension_numbers<[1], [0], [0], [1], [0, 0, 1, 1], [], []>} : vector<4x16xf32>, vector<16x8xf32>, vector<4x8xf32> -> vector<4x8xf32>
    %cst_11 = arith.constant dense<0.000000e+00> : vector<4x8xf32>
    %31 = tpu.matmul %1, %28, %cst_11 {dimension_numbers = #tpu.dot_dimension_numbers<[1], [0], [0], [1], [0, 0, 1, 1], [], []>} : vector<4x16xf32>, vector<16x8xf32>, vector<4x8xf32> -> vector<4x8xf32>
    %32 = tpu.iota {dimensions = array<i32: 1>} : vector<4x8xi32>
    %c0_i32_12 = arith.constant 0 : i32
    %33 = vector.broadcast %c0_i32_12 : i32 to vector<4x8xi32>
    %34 = arith.cmpi eq, %32, %33 : vector<4x8xi32>
    %cst_13 = arith.constant 0.000000e+00 : f32
    %35 = vector.shape_cast %5 : vector<4x1xf32> to vector<4x1xf32>
    %36 = vector.broadcast %35 : vector<4x1xf32> to vector<4x8xf32>
    %37 = vector.broadcast %cst_13 : f32 to vector<4x8xf32>
    %38 = arith.select %34, %36, %37 : vector<4x8xi1>, vector<4x8xf32>
    %39 = arith.addf %29, %38 : vector<4x8xf32>
    %c0_14 = arith.constant 0 : index
    %c0_15 = arith.constant 0 : index
    %c0_16 = arith.constant 0 : index
    %40 = vector.load %arg3[%c0_14, %c0_15, %c0_16] : memref<3x4x4xf32, #tpu.memory_space<vmem>>, vector<1x4x4xf32>
    %41 = vector.shape_cast %40 : vector<1x4x4xf32> to vector<4x4xf32>
    %cst_17 = arith.constant dense<0.000000e+00> : vector<4x8xf32>
    %42 = tpu.matmul %41, %39, %cst_17 {dimension_numbers = #tpu.dot_dimension_numbers<[1], [0], [0], [1], [0, 0, 1, 1], [], []>} : vector<4x4xf32>, vector<4x8xf32>, vector<4x8xf32> -> vector<4x8xf32>
    %c1 = arith.constant 1 : index
    %c0_18 = arith.constant 0 : index
    %c0_19 = arith.constant 0 : index
    %43 = vector.load %arg3[%c1, %c0_18, %c0_19] : memref<3x4x4xf32, #tpu.memory_space<vmem>>, vector<1x4x4xf32>
    %44 = vector.shape_cast %43 : vector<1x4x4xf32> to vector<4x4xf32>
    %cst_20 = arith.constant dense<0.000000e+00> : vector<4x8xf32>
    %45 = tpu.matmul %44, %30, %cst_20 {dimension_numbers = #tpu.dot_dimension_numbers<[1], [0], [0], [1], [0, 0, 1, 1], [], []>} : vector<4x4xf32>, vector<4x8xf32>, vector<4x8xf32> -> vector<4x8xf32>
    %46 = arith.addf %42, %45 : vector<4x8xf32>
    %c2 = arith.constant 2 : index
    %c0_21 = arith.constant 0 : index
    %c0_22 = arith.constant 0 : index
    %47 = vector.load %arg3[%c2, %c0_21, %c0_22] : memref<3x4x4xf32, #tpu.memory_space<vmem>>, vector<1x4x4xf32>
    %48 = vector.shape_cast %47 : vector<1x4x4xf32> to vector<4x4xf32>
    %cst_23 = arith.constant dense<0.000000e+00> : vector<4x8xf32>
    %49 = tpu.matmul %48, %31, %cst_23 {dimension_numbers = #tpu.dot_dimension_numbers<[1], [0], [0], [1], [0, 0, 1, 1], [], []>} : vector<4x4xf32>, vector<4x8xf32>, vector<4x8xf32> -> vector<4x8xf32>
    %50 = arith.addf %46, %49 : vector<4x8xf32>
    %c0_24 = arith.constant 0 : index
    %c0_25 = arith.constant 0 : index
    %51 = vector.load %arg4[%c0_24, %c0_25] : memref<4x1xf32, #tpu.memory_space<vmem>>, vector<4x1xf32>
    %52 = vector.broadcast %51 : vector<4x1xf32> to vector<4x8xf32>
    %53 = arith.addf %50, %52 : vector<4x8xf32>
    %c0_26 = arith.constant 0 : index
    %c0_27 = arith.constant 0 : index
    %c0_28 = arith.constant 0 : index
    %54 = vector.load %arg5[%c0_26, %c0_27, %c0_28] : memref<1x4x8xf32, #tpu.memory_space<vmem>>, vector<1x4x8xf32>
    %55 = vector.shape_cast %54 : vector<1x4x8xf32> to vector<4x8xf32>
    %56 = vector.shape_cast %53 : vector<4x8xf32> to vector<1x4x8xf32>
    tpu.vector_store %arg5[%c0_26, %c0_27, %c0_28], %56 {strides = array<i32>} : memref<1x4x8xf32, #tpu.memory_space<vmem>>, vector<1x4x8xf32>,
    return
  }
  func.func @transform_0(%arg0: i32, %arg1: i32) -> (i32, i32, i32) {
    %c0_i32 = arith.constant 0 : i32
    %c0_i32_0 = arith.constant 0 : i32
    return %arg0, %c0_i32, %arg1 : i32, i32, i32
  }
  func.func @transform_1(%arg0: i32, %arg1: i32) -> (i32, i32, i32) {
    %c0_i32 = arith.constant 0 : i32
    %c0_i32_0 = arith.constant 0 : i32
    %c0_i32_1 = arith.constant 0 : i32
    %c0_i32_2 = arith.constant 0 : i32
    return %c0_i32, %c0_i32_0, %c0_i32_1 : i32, i32, i32
  }
  func.func @transform_2(%arg0: i32, %arg1: i32) -> (i32, i32) {
    %c0_i32 = arith.constant 0 : i32
    %c0_i32_0 = arith.constant 0 : i32
    %c0_i32_1 = arith.constant 0 : i32
    return %c0_i32, %c0_i32_0 : i32, i32
  }
  func.func @transform_3(%arg0: i32, %arg1: i32) -> (i32, i32, i32) {
    %c0_i32 = arith.constant 0 : i32
    %c0_i32_0 = arith.constant 0 : i32
    return %arg0, %c0_i32, %arg1 : i32, i32, i32
  }
}

</mosaic_0001>

<bundles_post_ra>
// kernel: tpu_custom_call.1
= control target key start
LH: loop header
LB: loop body
LE: loop exit
PB: predicated region body
PF: predicated region fallthrough
CT: control target
= control target key end

     0   :  { %8 = vsyncpa [#allocation4], 0  ;;  %s1355_s0 = inlined_call_operand.hbm [shape: f32[2,4,16], index: 0, kind: input, shape index: {}]   ;;  %s1356_s1 = inlined_call_operand.hbm [shape: f32[3,4,4], index: 1, kind: input, shape index: {}]   ;;  %s1357_s2 = inlined_call_operand.vmem [shape: f32[4,1], index: 2, kind: input, shape index: {}]   ;;  %s1358_s3 = inlined_call_operand.hbm [shape: f32[2,4,8], index: 3, kind: output, shape index: {}]  }
   0x1   :  { %10 = vsyncpa [#allocation4 + $0x1], 0 }
   0x2   :  { %11 = vsyncpa [#allocation7], 0 }
   0x3   :  { %12 = vsyncpa [#allocation5], 0 }
   0x4   :  { %14 = vsyncpa [#allocation5 + $0x1], 0  ;;  %s1166_s12 = smov 0   ;;  %s1168_s13 = smov 0  }
   0x5   :  { %s1170_s14 = smov 0   ;;  %s1172_s15 = smov 0  }
   0x6   :  { %s1174_s16 = smov 0   ;;  %s1176_s17 = smov 0  }
   0x7 LB: > { %s827_s18 = sadd.s32 4294967295, %s1134_s17   ;;  %s828_s19 = sadd.s32 4294967294, %s1134_s17   ;;  %s1134_s17 = sphi %s1176_s17, %s20_s17   ;;  %s1130_s16 = sphi %s1174_s16, %s1376_s16   ;;  %s1126_s15 = sphi %s1172_s15, %s1375_s15   ;;  %s1122_s14 = sphi %s1170_s14, %s1374_s14   ;;  %s1118_s13 = sphi %s1168_s13, %s1373_s13   ;;  %s1114_s12 = sphi %s1166_s12, %s1372_s12  }
   0x8   : > { %p54_p0 = scmp.ne.s32.totalorder %s1118_s13, %s1114_s12  ;;  %p1200_p1 = scmp.eq.s32.totalorder %s827_s18, 0 }
   0x9   : > { %p1204_p2 = scmp.eq.s32.totalorder %s827_s18, 1  ;;  %p128_p3 = scmp.eq.s32.totalorder %s828_s19, 1 }
   0xa   : > { %p1210_p4 = por %p1200_p1, %p54_p0  ;;  %p829_p5 = scmp.ge.s32.totalorder %s1134_s17, 1 }
   0xb   : > { %p1215_p6 = por %p128_p3, %p54_p0  ;;  %p135_p7 = scmp.lt.s32.totalorder %s1134_s17, 3 }
   0xc   : > { %s1362_s22 = scalar_select %p1210_p4, 1, 0 }
   0xd   : > { %s1363_s23 = scalar_select %p1215_p6, 1, 0 }
   0xe   : > { %p1220_p8 = pnand %p829_p5, %p135_p7  ;;  %s1136_s25 = smov [#allocation6]  }
   0xf   : > { %s147_s26 = sshll.u32 %s1136_s25, 4  ;;  %s32_s28 = sadd.s32 1, %s1130_s16  ;;  %s148_s26 = int_to_ptr.vmem [resolvable:$true] %s147_s26 }
  0x10   : > { %p923_p9 = pneg %p1220_p8  ;;  %s1007_s29 = scalar_lea.vmem %s148_s26, 192 }
  0x11   : > { %p1008_p13 = scmp.ne.s32.totalorder %s148_s26, %s1007_s29  ;;  %p1015_p5 = scmp.lt.s32.totalorder %s148_s26, %s148_s26 }
  0x12   : > { %p1229_p11 = pnand %p923_p9, %p1200_p1  ;;  %p1016_p7 = scmp.lt.s32.totalorder %s1007_s29, %s1007_s29 }
  0x14   : > { %p998_p12 = pneg %p1229_p11  ;;  %p1017_p6 = por %p1016_p7, %p1015_p5 }
  0x16   : > { %p1010_p0 = pnand %p1008_p13, %p998_p12 }
  0x18   : > { %p1011_p3 = pneg %p1010_p0 }
  0x1a   : > { %p1018_p4 = pnand %p1017_p6, %p1011_p3 }
  0x1c   : > { %1021 = shalt.err (!%p1018_p4)
}
  0x1d   : > { %s1137_s30 = smov 64   ;;  %s1138_s4 = smov 4  }
  0x1e   : > { %926 = dma.hbm_to_vmem [thread:$0]  (!%p1229_p11), %s1356_s1, 192, %s148_s26, [#allocation7], %s1137_s30, %s1137_s30, %s1138_s4  }
  0x1f   : > { %p34_p6 = scmp.ge.s32.totalorder %s32_s28, 2  ;;  %s41_s7 = sadd.s32 1, %s1122_s14 }
  0x20   : > { %p48_p4 = scmp.ne.s32.totalorder %s1122_s14, %s1118_s13  ;;  %p49_p9 = scmp.eq.s32.totalorder %s1134_s17, 0 }
  0x21   : > { %s1378_s28 = smov (%p34_p6, %s32_s28), 0  ;;  %p936_p0 = scmp.lt.s32.totalorder %s1134_s17, 2 }
  0x22   : > { %p1247_p12 = por %p49_p9, %p48_p4  ;;  %p1253_p13 = por %p1204_p2, %p48_p4 }
  0x23   : > { %s36_s10 = ssub.s32 %s1130_s16, %s1378_s28  ;;  %s164_s11 = sand.u32 1, %s1122_s14  }
  0x24   : > { %p39_p11 = scmp.eq.s32.totalorder %s36_s10, 0  ;;  %s832_s18 = sshll.u32 %s164_s11, 2 }
  0x25   : > { %s833_s25 = sshll.u32 %s1130_s16, 6  ;;  %s168_s30 = scalar_lea.vmem [#allocation3], %s832_s18 }
  0x26   : > { %s1262_s19 = scalar_select %p39_p11, %s1122_s14, %s41_s7  }
  0x27   : > { %s174_s29 = scalar_lea.hbm %s1355_s0, %s833_s25  ;;  %s176_s4 = sshll.u32 %s168_s30, 4  ;;  %s177_s4 = int_to_ptr.vmem [resolvable:$true] %s176_s4 }
  0x28   : > { %p1270_p2 = pnand %p936_p0, %p1247_p12  ;;  %s165_s5 = scalar_lea.sflag [#allocation4], %s164_s11 }
  0x29   : > { %s1035_s6 = scalar_lea.vmem %s177_s4, 64  ;;  %s1139_s7 = smov [#allocation3]  }
  0x2a   : > { %p1024_p3 = pneg %p1270_p2  ;;  %p1036_p5 = scmp.ne.s32.totalorder %s177_s4, %s1035_s6 }
  0x2b   : > { %s1040_s10 = sshll.u32 %s1139_s7, 4  ;;  %s1041_s10 = int_to_ptr.vmem [resolvable:$false] %s1040_s10 }
  0x2c   : > { %p1038_p7 = pnand %p1036_p5, %p1024_p3  ;;  %s1042_s25 = scalar_lea.vmem %s1041_s10, 128 }
  0x2d   : > { %p1043_p4 = scmp.lt.s32.totalorder %s177_s4, %s1041_s10  ;;  %p1044_p9 = scmp.lt.s32.totalorder %s1042_s25, %s1035_s6 }
  0x2e   : > { %p1039_p6 = pneg %p1038_p7 }
  0x2f   : > { %p1045_p11 = por %p1044_p9, %p1043_p4 }
  0x31   : > { %p1046_p10 = pnand %p1045_p11, %p1039_p6 }
  0x33   : > { %1049 = shalt.err (!%p1046_p10)
}
  0x34   : > { %930 = dma.hbm_to_vmem [thread:$0]  (!%p1270_p2), %s174_s29, 64, %s177_s4, %s165_s5  }
  0x35   : > { %185 = sbr.rel (%p1220_p8) target bundleno = 483 (0x1e3), region = 32  ;;  %s1281_s8 = sand.u32 (!%p1220_p8), 1, %s1118_s13  }
  0x36   : > { %s835_s11 = sshll.u32 (!%p1220_p8), %s1281_s8, 2  ;;  %s188_s18 = scalar_lea.sflag (!%p1220_p8), [#allocation4], %s1281_s8 }
  0x37   : > { %s191_s26 = scalar_lea.vmem (!%p1220_p8), [#allocation3], %s835_s11  ;;  %p1369_p12 = scmp.ne.s32.totalorder (!%p1220_p8), %s1362_s22, 0 }
  0x3a   : > { %1101 = dma.done.wait (%p1369_p12), %s188_s18, 64  }
  0x3b   : > { %1103 = vsyncadd (%p1369_p12), %s188_s18, 4294967232 }
  0x3c   : > { %1105 = dma.done.wait (%p1200_p1), [#allocation7], 192  }
  0x3d   : > { %1107 = vsyncadd (%p1200_p1), [#allocation7], 4294967104  ;;  %v231_v0 = vlaneseq  ;;  %v1140_v1 = vmov 0.0   ;;  %vm1141_vm0 = vmmov 0   ;;  %v1142_v4 = vmov 0   ;;  %s1144_s24 = smov 113  }
  0x3e   : > { %879 = vmatprep.subr.mxu0 %v1140_v1  ;;  %883 = vmatprep.mubr.msk.f32.mxu0 %vm1141_vm0, %v1140_v1  ;;  %v1143_v9 = vmov 1.0   ;;  %v218_v10 = vld [vmem:[%s191_s26] sm:$0xf]  ;;  %vm257_vm3 = vcmask 130048   ;;  %vm484_vm8 = vcmask 1043456   ;;  %vm480_vm10 = vcmask 31744  }
  0x3f   : > { %v232_v2 = vshrl.u32 %v231_v0, 7  ;;  %v235_v3 = vand.u32 127, %v231_v0  ;;  %886 = vmatprep.subr.mxu1 %v1140_v1  ;;  %890 = vmatprep.mubr.msk.f32.mxu1 %vm1141_vm0, %v1140_v1  ;;  %v713_v11 = vld [vmem:[%s1357_s2] sm:$0xf]  ;;  %v479_v12 = vld [vmem:[#allocation6 + $0x4] sm:$0xf] }
  0x40   : > { %995 = vset.pattern.permute.xlu0 %v1142_v4  ;;  %226 = vrot.lane.b32.xlu1 %v218_v10, %s1144_s24  ;;  %v635_v17 = vld [vmem:[#allocation6 + $0x8] sm:$0xf]  ;;  %v477_v21 = vld [vmem:[#allocation6] sm:$0xf]  ;;  %s861_s27 = sshll.u32 %s1126_s15, 6  ;;  %s217_s29 = scalar_lea.vmem [#allocation8], %s835_s11 }
  0x41   : > { %v233_v5 = vadd.s32 8, %v232_v2  ;;  %v236_v6 = vmul.u32 2, %v235_v3  ;;  %403 = vperm.xlu0 %995, %v1140_v1   ;;  %vm400_vm9 = vcmp.eq.s32.totalorder %v235_v3, 0  ;;  %s737_s30 = sshll.u32 %s217_s29, 4  ;;  %vm720_vm11 = vcmask 60416   ;;  %s735_s5 = scalar_lea.hbm %s1358_s3, %s861_s27  ;;  %s738_s30 = int_to_ptr.vmem [resolvable:$true] %s737_s30 }
  0x42   : > { %s723_s6 = scalar_lea.sflag [#allocation5], %s1281_s8  ;;  %s1050_s7 = scalar_lea.vmem %s738_s30, 64 }
  0x43   : > { %vm245_vm1 = vcmp.eq.s32.totalorder %v233_v5, %v236_v6  ;;  %vm244_vm2 = vcmp.eq.s32.totalorder %v232_v2, %v236_v6  ;;  %v838_v7 = vadd.s32 4294967295, %v236_v6  ;;  %v250_v8 = vadd.s32 1, %v236_v6  ;;  %p1051_p1 = scmp.ne.s32.totalorder %s738_s30, %s1050_s7  ;;  %s1145_s15 = smov [#allocation8]  }
  0x44   : > { %880 = vmatpush3.msk.msra.mxu0 %vm245_vm1, %v1143_v9  ;;  %s1054_s10 = sshll.u32 %s1145_s15, 4  ;;  %s1055_s10 = int_to_ptr.vmem [resolvable:$false] %s1054_s10 }
  0x45   : > { %881 = vmatprep.subr.mxu0 %v1140_v1  ;;  %vm239_vm4 = vcmp.eq.s32.totalorder %v233_v5, %v838_v7  ;;  %vm252_vm5 = vcmp.eq.s32.totalorder %v233_v5, %v250_v8  ;;  %vm238_vm6 = vcmp.eq.s32.totalorder %v232_v2, %v838_v7  ;;  %vm251_vm7 = vcmp.eq.s32.totalorder %v232_v2, %v250_v8  ;;  %p1052_p8 = pnand %p1051_p1, %p1253_p13  ;;  %s1056_s25 = scalar_lea.vmem %s1055_s10, 128 }
  0x46   : > { %882 = vmatpush3.msk.msra.mxu0 %vm244_vm2, %v1143_v9  ;;  %887 = vmatpush3.msk.msra.mxu1 %vm252_vm5, %v1143_v9  ;;  %p1057_p0 = scmp.lt.s32.totalorder %s738_s30, %s1055_s10  ;;  %p1058_p2 = scmp.lt.s32.totalorder %s1056_s25, %s1050_s7 }
  0x47   : > { %884 = vmatmul.mubr.msk.f32.vlgmr.msra.gmra.mxu0 %vm257_vm3, %v218_v10  ;;  %893 = vmatprep.subr.mxu0 %v1140_v1  ;;  %p1053_p10 = pneg %p1052_p8 }
  0x48   : > { %894 = vmatpush3.msk.msra.mxu0 %vm239_vm4, %v1143_v9  ;;  %897 = vmatprep.mubr.msk.f32.mxu0 %vm1141_vm0, %v1140_v1  ;;  %p1059_p3 = por %p1058_p2, %p1057_p0 }
  0x49   : > { %895 = vmatprep.subr.mxu0 %v1140_v1  ;;  %888 = vmatprep.subr.mxu1 %v1140_v1 }
  0x4a   : > { %896 = vmatpush3.msk.msra.mxu0 %vm238_vm6, %v1143_v9  ;;  %889 = vmatpush3.msk.msra.mxu1 %vm251_vm7, %v1143_v9  ;;  %p1060_p5 = pnand %p1059_p3, %p1053_p10 }
  0x4b   : > { %898 = vmatmul.mubr.msk.f32.vlgmr.msra.gmra.mxu0 %vm257_vm3, %v218_v10  ;;  %891 = vmatmul.mubr.msk.f32.vlgmr.msra.gmra.mxu1 %vm257_vm3, %v218_v10 }
  0x4c   : > { %716 = vperm.xlu0 %995, %v713_v11   ;;  %900 = vmatprep.subr.mxu1 %v1140_v1 }
  0x4d   : > { %902 = vmatprep.mubr.msk.f32.mxu1 %vm1141_vm0, %v1140_v1  ;;  %905 = vmatprep.subr.mxu0 %v1140_v1 }
  0x4e   : > { %907 = vmatprep.mubr.msk.f32.mxu0 %vm1141_vm0, %v1140_v1 }
  0xb2   : > { %v227_v24 = vpop.permute.xlu1 %226 }
  0xbc   : > { %v404_v14 = vpop.permute.xlu0 %403 }
  0xbd   : > { %v406_v15 = vsel %vm400_vm9, %v404_v14, 0.0 }
  0xc7   : > { %v717_v33 = vpop.permute.xlu0 %716 }
 0x107   : > { %v326_v13 = vpop.f32.mrf.mxu0 }
 0x108   : > { %901 = vmatpush3.msk.msra.mxu1 %vm484_vm8, %v326_v13 }
 0x109   : > { %v885_v16 = vpop.f32.mrf.mxu0  ;;  %903 = vmatmul.mubr.msk.f32.vlgmr.msra.gmra.mxu1 %vm480_vm10, %v479_v12  ;;  %910 = vmatprep.subr.mxu1 %v1140_v1 }
 0x10a   : > { %912 = vmatprep.mubr.msk.f32.mxu1 %vm1141_vm0, %v1140_v1 }
 0x10b   : > { %v473_v18 = vpop.f32.mrf.mxu0  ;;  %v396_v19 = vpop.f32.mrf.mxu1 }
 0x10c   : > { %v474_v20 = vadd.f32 %v473_v18, %v406_v15  ;;  %911 = vmatpush3.msk.msra.mxu1 %vm484_vm8, %v396_v19 }
 0x10d   : > { %v899_v22 = vpop.f32.mrf.mxu0  ;;  %v892_v23 = vpop.f32.mrf.mxu1  ;;  %913 = vmatmul.mubr.msk.f32.vlgmr.msra.gmra.mxu1 %vm480_vm10, %v635_v17 }
 0x10e   : > { %906 = vmatpush3.msk.msra.mxu0 %vm484_vm8, %v474_v20 }
 0x10f   : > { %908 = vmatmul.mubr.msk.f32.vlgmr.msra.gmra.mxu0 %vm480_vm10, %v477_v21 }
 0x1c9   : > { %v554_v25 = vpop.f32.mrf.mxu1 }
 0x1cb   : > { %v904_v26 = vpop.f32.mrf.mxu1 }
 0x1cd   : > { %v708_v27 = vpop.f32.mrf.mxu1 }
 0x1cf   : > { %v630_v28 = vpop.f32.mrf.mxu0  ;;  %v914_v29 = vpop.f32.mrf.mxu1 }
 0x1d0   : > { %v631_v30 = vadd.f32 %v630_v28, %v554_v25 }
 0x1d1   : > { %v909_v31 = vpop.f32.mrf.mxu0 }
 0x1d2   : > { %v712_v32 = vadd.f32 %v708_v27, %v631_v30 }
 0x1d4   : > { %v719_v34 = vadd.f32 %v717_v33, %v712_v32 }
 0x1d6   : > { %721 = vst.msk [vmem:[%s217_s29] sm:$0xf] %vm720_vm11, %v719_v34 }
 0x1d7   : > { %1063 = shalt.err (!%p1060_p5)
}
 0x1d8   : > { %s1064_s11 = scalar_lea.hbm %s735_s5, 64  ;;  %s1068_s26 = scalar_lea.hbm %s1358_s3, 128 }
 0x1d9   : > { %p1065_p7 = scmp.ne.s32.totalorder %s735_s5, %s1064_s11  ;;  %p1069_p9 = scmp.lt.s32.totalorder %s735_s5, %s1358_s3 }
 0x1da   : > { %p1070_p11 = scmp.lt.s32.totalorder %s1068_s26, %s1064_s11 }
 0x1db   : > { %p1066_p6 = pnand %p1065_p7, %p1253_p13 }
 0x1dc   : > { %p1071_p12 = por %p1070_p11, %p1069_p9 }
 0x1dd   : > { %p1067_p4 = pneg %p1066_p6 }
 0x1df   : > { %p1072_p1 = pnand %p1071_p12, %p1067_p4 }
 0x1e1   : > { %1075 = shalt.err (!%p1072_p1)
}
 0x1e2   : > { %921 = dma.vmem_to_hbm [thread:$0]  (%p1253_p13), %s738_s30, 64, %s735_s5, %s723_s6  }
 0x1e3 PF: > { %s749_s24 = sand.u32 1, %s1114_s12   ;;  %p1370_p8 = scmp.ne.s32.totalorder %s1363_s23, 0 }
 0x1e4   : > { %p1371_p10 = scmp.ge.s32.totalorder %s1134_s17, 2  ;;  %s750_s27 = scalar_lea.sflag [#allocation5], %s749_s24 }
 0x1e6   : > { %p932_p0 = pnand %p1371_p10, %p1370_p8 }
 0x1e8   : > { %p933_p2 = pneg %p932_p0 }
 0x1ea   : > { %1109 = dma.done.wait (%p933_p2), %s750_s27, 64  }
 0x1eb   : > { %1111 = vsyncadd (%p933_p2), %s750_s27, 4294967232  ;;  %s20_s17 = sadd.s32 1, %s1134_s17   ;;  %s1372_s12 = smov %s1118_s13 }
 0x1ec   : > { %p17_p3 = scmp.ge.s32.totalorder %s20_s17, 4   ;;  %s1373_s13 = smov %s1122_s14 }
 0x1ed   : > { %s1374_s14 = smov %s1262_s19  ;;  %s1375_s15 = smov %s1130_s16 }
 0x1ee   : > { %s1376_s16 = smov %s1378_s28  ;;  %19 = sbr.rel (!%p17_p3) target bundleno = 7 (0x7), region = 83 }
 0x1f3   :  { %755 = vsyncpa [#allocation4], 1 }
 0x1f4   :  { %757 = vsyncpa [#allocation4 + $0x1], 1 }
 0x1f5   :  { %758 = vsyncpa [#allocation7], 1 }
 0x1f6   :  { %759 = vsyncpa [#allocation5], 1 }
 0x1f7   :  { %761 = vsyncpa [#allocation5 + $0x1], 1 }

</bundles_post_ra>
